<compile_context>
chip_gen: v7x
topology: tpu7x:2x2x1
jax: 0.10.0
libtpu: 0.0.40
codegen_flags: <defaults>
</compile_context>

<pallas_src>
import jax
import jax.numpy as jnp
from jax.experimental import pallas as pl
from jax.experimental.pallas import tpu as pltpu


def _triplet_embed_kernel(x1_ref, x2_ref, x3_ref,
                          w1_ref, b1_ref, w2_ref, b2_ref,
                          o1_ref, o2_ref, o3_ref):
    # Shared weights: constant index_map => DMA'd once, VMEM-resident across
    # all batch blocks of the grid.
    w1 = w1_ref[...]          # (D_in, H)    bf16
    b1 = b1_ref[...]          # (1, H)       f32
    w2 = w2_ref[...]          # (H, D_emb)   bf16
    b2 = b2_ref[...]          # (1, D_emb)   f32

    def embed(x_ref, o_ref):
        # bf16 MXU operands, f32 accumulation; f32 bias/relu epilogue on VPU.
        x = x_ref[...].astype(jnp.bfloat16)                       # (bm, D_in)
        h = jnp.dot(x, w1, preferred_element_type=jnp.float32) + b1
        h = jnp.maximum(h, 0.0)
        o = jnp.dot(h.astype(jnp.bfloat16), w2,
                    preferred_element_type=jnp.float32) + b2
        o_ref[...] = o.astype(o_ref.dtype)       # whole-ref, lane-dense store

    # Three independent dots against the shared weights; no concat, no slices.
    embed(x1_ref, o1_ref)
    embed(x2_ref, o2_ref)
    embed(x3_ref, o3_ref)


def triplet_net_forward(x1, x2, x3, params, *, block_b=128):
    """Shared-weight embedding applied to x1, x2, x3 (each NCHW).

    Contract: params = (w1_bf16, b1_f32, w2_bf16, b2_f32).  Weights are stored
    in bf16 once (see init_params); no per-call dtype casts happen here.
    """
    w1, b1, w2, b2 = params
    B = x1.shape[0]
    d_in = w1.shape[0]
    d_hidden = w1.shape[1]
    d_emb = w2.shape[1]

    # Flatten NCHW -> (B, D_in): contiguous reshape, no HBM copy.
    x1f = x1.reshape(B, d_in)
    x2f = x2.reshape(B, d_in)
    x3f = x3.reshape(B, d_in)

    # Batch-block grid (amortizes the one-time weight DMA over all blocks and
    # lets v7x shard blocks across its 2 TensorCores).
    bm = B if B <= block_b else block_b
    assert B % bm == 0, "batch must be divisible by the batch block"
    grid = (B // bm,)

    x_spec = pl.BlockSpec((bm, d_in), lambda i: (i, 0))
    o_spec = pl.BlockSpec((bm, d_emb), lambda i: (i, 0))
    # Constant index_map -> weights/biases stay resident in VMEM across the grid.
    w1_spec = pl.BlockSpec((d_in, d_hidden), lambda i: (0, 0))
    b1_spec = pl.BlockSpec((1, d_hidden), lambda i: (0, 0))
    w2_spec = pl.BlockSpec((d_hidden, d_emb), lambda i: (0, 0))
    b2_spec = pl.BlockSpec((1, d_emb), lambda i: (0, 0))

    out_sd = jax.ShapeDtypeStruct((B, d_emb), jnp.float32)

    # TODO(synk): for a real embedding_net with very large D_in (W1 >> VMEM),
    # add a K-tiling grid axis + f32 VMEM accumulator; size tiles for v7x's
    # 64 MiB VMEM (double-buffered input tiles + accumulator <= ~48 MiB) and
    # raise vmem_limit_bytes explicitly.
    return pl.pallas_call(
        _triplet_embed_kernel,
        out_shape=(out_sd, out_sd, out_sd),
        grid_spec=pltpu.PrefetchScalarGridSpec(
            num_scalar_prefetch=0,
            grid=grid,
            in_specs=[x_spec, x_spec, x_spec,
                      w1_spec, b1_spec, w2_spec, b2_spec],
            out_specs=(o_spec, o_spec, o_spec),
        ),
        compiler_params=pltpu.CompilerParams(
            dimension_semantics=("parallel",),
        ),
    )(x1f, x2f, x3f, w1, b1, w2, b2)


def init_params(key, d_in, d_hidden, d_emb):
    k1, k2, k3, k4 = jax.random.split(key, 4)
    # Weights stored in bf16 ONCE (MXU-native); biases stay f32 for the VPU
    # epilogue.  The forward pass never re-casts weights per call.
    w1 = (jax.random.normal(k1, (d_in, d_hidden), jnp.float32)
          * (1.0 / d_in) ** 0.5).astype(jnp.bfloat16)
    b1 = jax.random.normal(k2, (1, d_hidden), jnp.float32) * 0.01
    w2 = (jax.random.normal(k3, (d_hidden, d_emb), jnp.float32)
          * (1.0 / d_hidden) ** 0.5).astype(jnp.bfloat16)
    b2 = jax.random.normal(k4, (1, d_emb), jnp.float32) * 0.01
    return w1, b1, w2, b2


if __name__ == "__main__":
    # Small shapes: batch=2, channels=4, spatial=16 -> D_in = 4*16*16 = 1024.
    B, C, H, W = 2, 4, 16, 16
    D_IN = C * H * W
    D_HIDDEN = 128
    D_EMB = 128

    key = jax.random.PRNGKey(0)
    kx1, kx2, kx3, kp = jax.random.split(key, 4)
    x1 = jax.random.normal(kx1, (B, C, H, W), jnp.float32)
    x2 = jax.random.normal(kx2, (B, C, H, W), jnp.float32)
    x3 = jax.random.normal(kx3, (B, C, H, W), jnp.float32)
    params = init_params(kp, D_IN, D_HIDDEN, D_EMB)

    o1, o2, o3 = triplet_net_forward(x1, x2, x3, params)
    jax.block_until_ready((o1, o2, o3))

    # Pure-JAX reference with the identical bf16-operand / f32-accumulate
    # contraction (bf16 weights are the stated contract of this kernel).
    def ref_embed(x):
        w1, b1, w2, b2 = params
        xb = x.reshape(B, D_IN).astype(jnp.bfloat16)
        h = jnp.dot(xb, w1, preferred_element_type=jnp.float32) + b1
        h = jnp.maximum(h, 0.0)
        return jnp.dot(h.astype(jnp.bfloat16), w2,
                       preferred_element_type=jnp.float32) + b2

    for out, x in ((o1, x1), (o2, x2), (o3, x3)):
        assert out.shape == (B, D_EMB)
        assert out.dtype == jnp.float32
        assert jnp.allclose(out, ref_embed(x), atol=1e-3, rtol=1e-3)

    print("KERNEL_OK")
</pallas_src>

<mosaic_0001>
module attributes {stable_mosaic.version = 11 : i64} {
  func.func @_triplet_embed_kernel(%arg0: i32, %arg1: memref<2x1024xf32, #tpu.memory_space<vmem>>, %arg2: memref<2x1024xf32, #tpu.memory_space<vmem>>, %arg3: memref<2x1024xf32, #tpu.memory_space<vmem>>, %arg4: memref<1024x128xbf16, #tpu.memory_space<vmem>>, %arg5: memref<1x128xf32, #tpu.memory_space<vmem>>, %arg6: memref<128x128xbf16, #tpu.memory_space<vmem>>, %arg7: memref<1x128xf32, #tpu.memory_space<vmem>>, %arg8: memref<2x128xf32, #tpu.memory_space<vmem>>, %arg9: memref<2x128xf32, #tpu.memory_space<vmem>>, %arg10: memref<2x128xf32, #tpu.memory_space<vmem>>) attributes {dimension_semantics = [#tpu.dimension_semantics<parallel>], iteration_bounds = array<i64: 1>, scalar_prefetch = 0 : i64, scratch_operands = 0 : i64, tpu.core_type = #tpu.core_type<tc>, window_params = [{transform_indices = @transform_0, window_bounds = array<i64: 2, 1024>}, {transform_indices = @transform_1, window_bounds = array<i64: 2, 1024>}, {transform_indices = @transform_2, window_bounds = array<i64: 2, 1024>}, {pipeline_mode = #tpu.pipeline_mode<synchronous>, transform_indices = @transform_3, window_bounds = array<i64: 1024, 128>}, {pipeline_mode = #tpu.pipeline_mode<synchronous>, transform_indices = @transform_4, window_bounds = array<i64: 1, 128>}, {pipeline_mode = #tpu.pipeline_mode<synchronous>, transform_indices = @transform_5, window_bounds = array<i64: 128, 128>}, {pipeline_mode = #tpu.pipeline_mode<synchronous>, transform_indices = @transform_6, window_bounds = array<i64: 1, 128>}, {transform_indices = @transform_7, window_bounds = array<i64: 2, 128>}, {transform_indices = @transform_8, window_bounds = array<i64: 2, 128>}, {transform_indices = @transform_9, window_bounds = array<i64: 2, 128>}]} {
    %c0 = arith.constant 0 : index
    %c0_0 = arith.constant 0 : index
    %0 = vector.load %arg4[%c0, %c0_0] : memref<1024x128xbf16, #tpu.memory_space<vmem>>, vector<1024x128xbf16>
    %c0_1 = arith.constant 0 : index
    %c0_2 = arith.constant 0 : index
    %1 = vector.load %arg5[%c0_1, %c0_2] : memref<1x128xf32, #tpu.memory_space<vmem>>, vector<1x128xf32>
    %c0_3 = arith.constant 0 : index
    %c0_4 = arith.constant 0 : index
    %2 = vector.load %arg6[%c0_3, %c0_4] : memref<128x128xbf16, #tpu.memory_space<vmem>>, vector<128x128xbf16>
    %c0_5 = arith.constant 0 : index
    %c0_6 = arith.constant 0 : index
    %3 = vector.load %arg7[%c0_5, %c0_6] : memref<1x128xf32, #tpu.memory_space<vmem>>, vector<1x128xf32>
    %c0_7 = arith.constant 0 : index
    %c0_8 = arith.constant 0 : index
    %4 = vector.load %arg1[%c0_7, %c0_8] : memref<2x1024xf32, #tpu.memory_space<vmem>>, vector<2x1024xf32>
    %5 = arith.truncf %4 : vector<2x1024xf32> to vector<2x1024xbf16>
    %cst = arith.constant dense<0.000000e+00> : vector<2x128xf32>
    %6 = tpu.matmul %5, %0, %cst {dimension_numbers = #tpu.dot_dimension_numbers<[1], [0], [0], [1], [0, 0, 1, 1], [], []>} : vector<2x1024xbf16>, vector<1024x128xbf16>, vector<2x128xf32> -> vector<2x128xf32>
    %7 = vector.broadcast %1 : vector<1x128xf32> to vector<2x128xf32>
    %8 = arith.addf %6, %7 : vector<2x128xf32>
    %cst_9 = arith.constant 0.000000e+00 : f32
    %9 = vector.broadcast %cst_9 : f32 to vector<2x128xf32>
    %10 = arith.maximumf %8, %9 : vector<2x128xf32>
    %11 = arith.truncf %10 : vector<2x128xf32> to vector<2x128xbf16>
    %cst_10 = arith.constant dense<0.000000e+00> : vector<2x128xf32>
    %12 = tpu.matmul %11, %2, %cst_10 {dimension_numbers = #tpu.dot_dimension_numbers<[1], [0], [0], [1], [0, 0, 1, 1], [], []>} : vector<2x128xbf16>, vector<128x128xbf16>, vector<2x128xf32> -> vector<2x128xf32>
    %13 = vector.broadcast %3 : vector<1x128xf32> to vector<2x128xf32>
    %14 = arith.addf %12, %13 : vector<2x128xf32>
    %c0_11 = arith.constant 0 : index
    %c0_12 = arith.constant 0 : index
    %15 = vector.load %arg8[%c0_11, %c0_12] : memref<2x128xf32, #tpu.memory_space<vmem>>, vector<2x128xf32>
    tpu.vector_store %arg8[%c0_11, %c0_12], %14 {strides = array<i32>} : memref<2x128xf32, #tpu.memory_space<vmem>>, vector<2x128xf32>,
    %c0_13 = arith.constant 0 : index
    %c0_14 = arith.constant 0 : index
    %16 = vector.load %arg2[%c0_13, %c0_14] : memref<2x1024xf32, #tpu.memory_space<vmem>>, vector<2x1024xf32>
    %17 = arith.truncf %16 : vector<2x1024xf32> to vector<2x1024xbf16>
    %cst_15 = arith.constant dense<0.000000e+00> : vector<2x128xf32>
    %18 = tpu.matmul %17, %0, %cst_15 {dimension_numbers = #tpu.dot_dimension_numbers<[1], [0], [0], [1], [0, 0, 1, 1], [], []>} : vector<2x1024xbf16>, vector<1024x128xbf16>, vector<2x128xf32> -> vector<2x128xf32>
    %19 = vector.broadcast %1 : vector<1x128xf32> to vector<2x128xf32>
    %20 = arith.addf %18, %19 : vector<2x128xf32>
    %cst_16 = arith.constant 0.000000e+00 : f32
    %21 = vector.broadcast %cst_16 : f32 to vector<2x128xf32>
    %22 = arith.maximumf %20, %21 : vector<2x128xf32>
    %23 = arith.truncf %22 : vector<2x128xf32> to vector<2x128xbf16>
    %cst_17 = arith.constant dense<0.000000e+00> : vector<2x128xf32>
    %24 = tpu.matmul %23, %2, %cst_17 {dimension_numbers = #tpu.dot_dimension_numbers<[1], [0], [0], [1], [0, 0, 1, 1], [], []>} : vector<2x128xbf16>, vector<128x128xbf16>, vector<2x128xf32> -> vector<2x128xf32>
    %25 = vector.broadcast %3 : vector<1x128xf32> to vector<2x128xf32>
    %26 = arith.addf %24, %25 : vector<2x128xf32>
    %c0_18 = arith.constant 0 : index
    %c0_19 = arith.constant 0 : index
    %27 = vector.load %arg9[%c0_18, %c0_19] : memref<2x128xf32, #tpu.memory_space<vmem>>, vector<2x128xf32>
    tpu.vector_store %arg9[%c0_18, %c0_19], %26 {strides = array<i32>} : memref<2x128xf32, #tpu.memory_space<vmem>>, vector<2x128xf32>,
    %c0_20 = arith.constant 0 : index
    %c0_21 = arith.constant 0 : index
    %28 = vector.load %arg3[%c0_20, %c0_21] : memref<2x1024xf32, #tpu.memory_space<vmem>>, vector<2x1024xf32>
    %29 = arith.truncf %28 : vector<2x1024xf32> to vector<2x1024xbf16>
    %cst_22 = arith.constant dense<0.000000e+00> : vector<2x128xf32>
    %30 = tpu.matmul %29, %0, %cst_22 {dimension_numbers = #tpu.dot_dimension_numbers<[1], [0], [0], [1], [0, 0, 1, 1], [], []>} : vector<2x1024xbf16>, vector<1024x128xbf16>, vector<2x128xf32> -> vector<2x128xf32>
    %31 = vector.broadcast %1 : vector<1x128xf32> to vector<2x128xf32>
    %32 = arith.addf %30, %31 : vector<2x128xf32>
    %cst_23 = arith.constant 0.000000e+00 : f32
    %33 = vector.broadcast %cst_23 : f32 to vector<2x128xf32>
    %34 = arith.maximumf %32, %33 : vector<2x128xf32>
    %35 = arith.truncf %34 : vector<2x128xf32> to vector<2x128xbf16>
    %cst_24 = arith.constant dense<0.000000e+00> : vector<2x128xf32>
    %36 = tpu.matmul %35, %2, %cst_24 {dimension_numbers = #tpu.dot_dimension_numbers<[1], [0], [0], [1], [0, 0, 1, 1], [], []>} : vector<2x128xbf16>, vector<128x128xbf16>, vector<2x128xf32> -> vector<2x128xf32>
    %37 = vector.broadcast %3 : vector<1x128xf32> to vector<2x128xf32>
    %38 = arith.addf %36, %37 : vector<2x128xf32>
    %c0_25 = arith.constant 0 : index
    %c0_26 = arith.constant 0 : index
    %39 = vector.load %arg10[%c0_25, %c0_26] : memref<2x128xf32, #tpu.memory_space<vmem>>, vector<2x128xf32>
    tpu.vector_store %arg10[%c0_25, %c0_26], %38 {strides = array<i32>} : memref<2x128xf32, #tpu.memory_space<vmem>>, vector<2x128xf32>,
    return
  }
  func.func @transform_0(%arg0: i32) -> (i32, i32) {
    %c0_i32 = arith.constant 0 : i32
    %c0_i32_0 = arith.constant 0 : i32
    return %arg0, %c0_i32 : i32, i32
  }
  func.func @transform_1(%arg0: i32) -> (i32, i32) {
    %c0_i32 = arith.constant 0 : i32
    %c0_i32_0 = arith.constant 0 : i32
    return %arg0, %c0_i32 : i32, i32
  }
  func.func @transform_2(%arg0: i32) -> (i32, i32) {
    %c0_i32 = arith.constant 0 : i32
    %c0_i32_0 = arith.constant 0 : i32
    return %arg0, %c0_i32 : i32, i32
  }
  func.func @transform_3(%arg0: i32) -> (i32, i32) {
    %c0_i32 = arith.constant 0 : i32
    %c0_i32_0 = arith.constant 0 : i32
    %c0_i32_1 = arith.constant 0 : i32
    return %c0_i32, %c0_i32_0 : i32, i32
  }
  func.func @transform_4(%arg0: i32) -> (i32, i32) {
    %c0_i32 = arith.constant 0 : i32
    %c0_i32_0 = arith.constant 0 : i32
    %c0_i32_1 = arith.constant 0 : i32
    return %c0_i32, %c0_i32_0 : i32, i32
  }
  func.func @transform_5(%arg0: i32) -> (i32, i32) {
    %c0_i32 = arith.constant 0 : i32
    %c0_i32_0 = arith.constant 0 : i32
    %c0_i32_1 = arith.constant 0 : i32
    return %c0_i32, %c0_i32_0 : i32, i32
  }
  func.func @transform_6(%arg0: i32) -> (i32, i32) {
    %c0_i32 = arith.constant 0 : i32
    %c0_i32_0 = arith.constant 0 : i32
    %c0_i32_1 = arith.constant 0 : i32
    return %c0_i32, %c0_i32_0 : i32, i32
  }
  func.func @transform_7(%arg0: i32) -> (i32, i32) {
    %c0_i32 = arith.constant 0 : i32
    %c0_i32_0 = arith.constant 0 : i32
    return %arg0, %c0_i32 : i32, i32
  }
  func.func @transform_8(%arg0: i32) -> (i32, i32) {
    %c0_i32 = arith.constant 0 : i32
    %c0_i32_0 = arith.constant 0 : i32
    return %arg0, %c0_i32 : i32, i32
  }
  func.func @transform_9(%arg0: i32) -> (i32, i32) {
    %c0_i32 = arith.constant 0 : i32
    %c0_i32_0 = arith.constant 0 : i32
    return %arg0, %c0_i32 : i32, i32
  }
}

</mosaic_0001>

<bundles_post_ra>
// kernel: tpu_custom_call.1
= control target key start
LH: loop header
LB: loop body
LE: loop exit
PB: predicated region body
PF: predicated region fallthrough
CT: control target
= control target key end

     0   :  { %15 = vsyncpa [#allocation3], 0  ;;  %s2819_s0 = inlined_call_operand.hbm [shape: f32[2,1024], index: 0, kind: input, shape index: {}]   ;;  %s2820_s1 = inlined_call_operand.hbm [shape: f32[2,1024], index: 1, kind: input, shape index: {}]   ;;  %s2821_s2 = inlined_call_operand.hbm [shape: f32[2,1024], index: 2, kind: input, shape index: {}]   ;;  %s2822_s3 = inlined_call_operand.hbm [shape: bf16[1024,128], index: 3, kind: input, shape index: {}]   ;;  %s2823_s4 = inlined_call_operand.vmem [shape: f32[1,128], index: 4, kind: input, shape index: {}]   ;;  %s2824_s5 = inlined_call_operand.hbm [shape: bf16[128,128], index: 5, kind: input, shape index: {}]   ;;  %s2825_s6 = inlined_call_operand.vmem [shape: f32[1,128], index: 6, kind: input, shape index: {}]   ;;  %s2826_s7 = inlined_call_operand.hbm [shape: f32[2,128], index: 7, kind: output, shape index: {0}]   ;;  %s2827_s8 = inlined_call_operand.hbm [shape: f32[2,128], index: 8, kind: output, shape index: {1}]   ;;  %s2828_s9 = inlined_call_operand.hbm [shape: f32[2,128], index: 9, kind: output, shape index: {2}]  }
   0x1   :  { %16 = vsyncpa [#allocation6], 0 }
   0x2   :  { %17 = vsyncpa [#allocation9], 0 }
   0x3   :  { %18 = vsyncpa [#allocation4], 0 }
   0x4   :  { %19 = vsyncpa [#allocation13], 0  ;;  %s2208_s30 = smov [#allocation5]   ;;  %s2209_s11 = smov [#allocation8]  }
   0x5   :  { %s36_s10 = sshll.u32 %s2208_s30, 4  ;;  %s55_s12 = sshll.u32 %s2209_s11, 4  ;;  %s37_s10 = int_to_ptr.vmem [resolvable:$true] %s36_s10  ;;  %s2271_s12 = int_to_ptr.vmem [resolvable:$true] %s55_s12 }
   0x6   :  { %s2022_s15 = scalar_lea.hbm %s2820_s1, 256 }
   0x7   :  { %p2023_p0 = scmp.ne.s32.totalorder %s2820_s1, %s2022_s15  ;;  %p2026_p1 = scmp.lt.u32.totalorder %s2022_s15, %s2820_s1 }
   0x9   :  { %p2028_p2 = pnand %p2026_p1, %p2023_p0 }
   0xb   :  { %2031 = shalt.err (!%p2028_p2)
}
   0xc   :  { %s2032_s20 = scalar_lea.vmem %s37_s10, 256  ;;  %p2037_p4 = scmp.lt.s32.totalorder %s37_s10, %s37_s10 }
   0xd   :  { %p2033_p3 = scmp.ne.s32.totalorder %s37_s10, %s2032_s20  ;;  %p2038_p5 = scmp.lt.s32.totalorder %s2032_s20, %s2032_s20 }
   0xf   :  { %p2039_p6 = por %p2038_p5, %p2037_p4 }
  0x11   :  { %p2040_p7 = pnand %p2039_p6, %p2033_p3 }
  0x13   :  { %2043 = shalt.err (!%p2040_p7)
}
  0x14   :  { %39 = dma.hbm_to_vmem [thread:$0]  %s2820_s1, 256, %s37_s10, [#allocation6]  }
  0x15   :  { %s2044_s25 = scalar_lea.hbm %s2822_s3, 8192 }
  0x16   :  { %p2045_p8 = scmp.ne.s32.totalorder %s2822_s3, %s2044_s25  ;;  %p2048_p9 = scmp.lt.u32.totalorder %s2044_s25, %s2822_s3 }
  0x18   :  { %p2050_p10 = pnand %p2048_p9, %p2045_p8 }
  0x1a   :  { %2053 = shalt.err (!%p2050_p10)
}
  0x1b   :  { %s2054_s30 = scalar_lea.vmem %s2271_s12, 8192  ;;  %p2059_p12 = scmp.lt.s32.totalorder %s2271_s12, %s2271_s12 }
  0x1c   :  { %p2055_p11 = scmp.ne.s32.totalorder %s2271_s12, %s2054_s30  ;;  %p2060_p13 = scmp.lt.s32.totalorder %s2054_s30, %s2054_s30 }
  0x1e   :  { %p2061_p0 = por %p2060_p13, %p2059_p12 }
  0x20   :  { %p2062_p1 = pnand %p2061_p0, %p2055_p11 }
  0x22   :  { %2065 = shalt.err (!%p2062_p1)
}
  0x23   :  { %s2210_s1 = smov 64   ;;  %s2211_s10 = smov 4  }
  0x24   :  { %61 = dma.hbm_to_vmem [thread:$0]  %s2822_s3, 8192, %s2271_s12, [#allocation9], %s2210_s1, %s2210_s1, %s2211_s10  }
  0x25   :  { %s2212_s14 = smov [#allocation2]   ;;  %s2213_s16 = smov [#allocation7]  }
  0x26   :  { %s26_s15 = sshll.u32 %s2212_s14, 4  ;;  %s46_s17 = sshll.u32 %s2213_s16, 4  ;;  %s27_s15 = int_to_ptr.vmem [resolvable:$true] %s26_s15  ;;  %s47_s17 = int_to_ptr.vmem [resolvable:$true] %s46_s17 }
  0x27   :  { %s2066_s20 = scalar_lea.hbm %s2819_s0, 256 }
  0x28   :  { %p2067_p2 = scmp.ne.s32.totalorder %s2819_s0, %s2066_s20  ;;  %p2070_p3 = scmp.lt.u32.totalorder %s2066_s20, %s2819_s0 }
  0x2a   :  { %p2072_p4 = pnand %p2070_p3, %p2067_p2 }
  0x2c   :  { %2075 = shalt.err (!%p2072_p4)
}
  0x2d   :  { %s2076_s3 = scalar_lea.vmem %s27_s15, 256  ;;  %p2081_p6 = scmp.lt.s32.totalorder %s27_s15, %s27_s15 }
  0x2e   :  { %p2077_p5 = scmp.ne.s32.totalorder %s27_s15, %s2076_s3  ;;  %p2082_p7 = scmp.lt.s32.totalorder %s2076_s3, %s2076_s3 }
  0x30   :  { %p2083_p8 = por %p2082_p7, %p2081_p6 }
  0x32   :  { %p2084_p9 = pnand %p2083_p8, %p2077_p5 }
  0x34   :  { %2087 = shalt.err (!%p2084_p9)
}
  0x35   :  { %29 = dma.hbm_to_vmem [thread:$0]  %s2819_s0, 256, %s27_s15, [#allocation3]  }
  0x36   :  { %s2088_s28 = scalar_lea.hbm %s2821_s2, 256 }
  0x37   :  { %p2089_p10 = scmp.ne.s32.totalorder %s2821_s2, %s2088_s28  ;;  %p2092_p11 = scmp.lt.u32.totalorder %s2088_s28, %s2821_s2 }
  0x39   :  { %p2094_p12 = pnand %p2092_p11, %p2089_p10 }
  0x3b   :  { %2097 = shalt.err (!%p2094_p12)
}
  0x3c   :  { %s2098_s14 = scalar_lea.vmem %s47_s17, 256  ;;  %p2103_p0 = scmp.lt.s32.totalorder %s47_s17, %s47_s17 }
  0x3d   :  { %p2099_p13 = scmp.ne.s32.totalorder %s47_s17, %s2098_s14  ;;  %p2104_p1 = scmp.lt.s32.totalorder %s2098_s14, %s2098_s14 }
  0x3f   :  { %p2105_p2 = por %p2104_p1, %p2103_p0 }
  0x41   :  { %p2106_p3 = pnand %p2105_p2, %p2099_p13 }
  0x43   :  { %2109 = shalt.err (!%p2106_p3)
}
  0x44   :  { %49 = dma.hbm_to_vmem [thread:$0]  %s2821_s2, 256, %s47_s17, [#allocation6]  }
  0x45   :  { %s2214_s16 = smov [#allocation10]   ;;  %s2110_s21 = scalar_lea.hbm %s2824_s5, 1024 }
  0x46   :  { %s69_s18 = sshll.u32 %s2214_s16, 4  ;;  %p2111_p4 = scmp.ne.s32.totalorder %s2824_s5, %s2110_s21  ;;  %s70_s18 = int_to_ptr.vmem [resolvable:$true] %s69_s18 }
  0x47   :  { %p2114_p5 = scmp.lt.u32.totalorder %s2110_s21, %s2824_s5 }
  0x49   :  { %p2116_p6 = pnand %p2114_p5, %p2111_p4 }
  0x4b   :  { %2119 = shalt.err (!%p2116_p6)
}
  0x4c   :  { %s2120_s12 = scalar_lea.vmem %s70_s18, 1024  ;;  %p2125_p8 = scmp.lt.s32.totalorder %s70_s18, %s70_s18 }
  0x4d   :  { %p2121_p7 = scmp.ne.s32.totalorder %s70_s18, %s2120_s12  ;;  %p2126_p9 = scmp.lt.s32.totalorder %s2120_s12, %s2120_s12 }
  0x4f   :  { %p2127_p10 = por %p2126_p9, %p2125_p8 }
  0x51   :  { %p2128_p11 = pnand %p2127_p10, %p2121_p7 }
  0x53   :  { %2131 = shalt.err (!%p2128_p11)
}
  0x54   :  { %75 = dma.hbm_to_vmem [thread:$0]  %s2824_s5, 1024, %s70_s18, [#allocation9], %s2210_s1, %s2210_s1, %s2211_s10  }
  0x55   :  { %2198 = dma.done.wait [#allocation3], 256  }
  0x56   :  { %2199 = vsyncadd [#allocation3], 4294967040 }
  0x57   :  { %2200 = dma.done.wait [#allocation6], 512  }
  0x58   :  { %2201 = vsyncadd [#allocation6], 4294966784 }
  0x59   :  { %2202 = dma.done.wait [#allocation9], 9216  }
  0x5a   :  { %2203 = vsyncadd [#allocation9], 4294958080  ;;  %v2344_v0 = vld [vmem:[#allocation8 + $0x40] sm:$0xff]   ;;  %v2355_v4 = vld [vmem:[#allocation8 + $0x48] sm:$0xff]   ;;  %v2215_v22 = vmov 1983009808   ;;  %v248_v24 = vlaneseq }
  0x5b   :  { %v2346_v1 = vld [vmem:[#allocation8 + $0xc0] sm:$0xff]   ;;  %1573 = vmatprep.subr.bf16.mxu0 %v2344_v0  ;;  %v2358_v5 = vld [vmem:[#allocation8 + $0xc8] sm:$0xff]   ;;  %v2367_v8 = vld [vmem:[#allocation8 + $0x50] sm:$0xff]   ;;  %v246_v23 = vunpack.c.l.s4 %v2215_v22  ;;  %vm2217_vm0 = vmmov 0   ;;  %s2219_s26 = smov [#allocation11]  }
  0x5c   :  { %v2349_v2 = vld [vmem:[#allocation8] sm:$0xff]   ;;  %1595 = vmatprep.subr.bf16.mxu1 %v2346_v1  ;;  %v2361_v6 = vld [vmem:[#allocation8 + $0x8] sm:$0xff]   ;;  %v2370_v9 = vld [vmem:[#allocation8 + $0xd0] sm:$0xff]   ;;  %v249_v30 = vshrl.u32 %v248_v24, 7  ;;  %s1461_s27 = sshll.u32 %s2219_s26, 4  ;;  %s1462_s27 = int_to_ptr.vmem [resolvable:$true] %s1461_s27 }
  0x5d   :  { %v2352_v3 = vld [vmem:[#allocation8 + $0x80] sm:$0xff]   ;;  %1574 = vmatpush3.bf16.msra.mxu0 %v2349_v2  ;;  %v2364_v7 = vld [vmem:[#allocation8 + $0x88] sm:$0xff]   ;;  %v2373_v10 = vld [vmem:[#allocation8 + $0x10] sm:$0xff]   ;;  %v247_v29 = vunpack.c.0.s8 %v246_v23 }
  0x5e   :  { %1596 = vmatpush3.bf16.msra.mxu1 %v2352_v3  ;;  %1575 = vmatprep.subr.bf16.mxu0 %v2355_v4  ;;  %v2376_v11 = vld [vmem:[#allocation8 + $0x90] sm:$0xff]   ;;  %v2379_v12 = vld [vmem:[#allocation8 + $0x58] sm:$0xff]   ;;  %v2391_v16 = vld [vmem:[#allocation8 + $0x60] sm:$0xff]  }
  0x5f   :  { %1597 = vmatprep.subr.bf16.mxu1 %v2358_v5  ;;  %v2382_v13 = vld [vmem:[#allocation8 + $0xd8] sm:$0xff]   ;;  %v2394_v17 = vld [vmem:[#allocation8 + $0xe0] sm:$0xff]   ;;  %v2403_v20 = vld [vmem:[#allocation8 + $0x68] sm:$0xff]   ;;  %v2432_v35 = vsub.s32 %v247_v29, %v249_v30 }
  0x60   :  { %v2385_v14 = vld [vmem:[#allocation8 + $0x18] sm:$0xff]   ;;  %v2397_v18 = vld [vmem:[#allocation8 + $0x20] sm:$0xff]   ;;  %v2406_v21 = vld [vmem:[#allocation8 + $0xe8] sm:$0xff]  }
  0x61   :  { %1576 = vmatpush3.bf16.msra.mxu0 %v2361_v6  ;;  %v2388_v15 = vld [vmem:[#allocation8 + $0x98] sm:$0xff]   ;;  %v2400_v19 = vld [vmem:[#allocation8 + $0xa0] sm:$0xff]   ;;  %v2409_v25 = vld [vmem:[#allocation8 + $0x28] sm:$0xff]  }
  0x62   :  { %1598 = vmatpush3.bf16.msra.mxu1 %v2364_v7  ;;  %1577 = vmatprep.subr.bf16.mxu0 %v2367_v8  ;;  %v2412_v26 = vld [vmem:[#allocation8 + $0xa8] sm:$0xff]   ;;  %v2415_v27 = vld [vmem:[#allocation8 + $0x70] sm:$0xff]   ;;  %v2427_v33 = vld [vmem:[#allocation8 + $0x78] sm:$0xff]  }
  0x63   :  { %1599 = vmatprep.subr.bf16.mxu1 %v2370_v9  ;;  %v2418_v28 = vld [vmem:[#allocation8 + $0xf0] sm:$0xff]   ;;  %2875 = vst [vmem:[#allocation21_spill] sm:$0xff] %v2427_v33  ;;  %v2430_v34 = vld [vmem:[#allocation8 + $0xf8] sm:$0xff]   ;;  %v2443_v41 = vld [vmem:[#allocation8 + $0x140] sm:$0xff]  }
  0x64   :  { %v2421_v31 = vld [vmem:[#allocation8 + $0x30] sm:$0xff]   ;;  %v2435_v36 = vld [vmem:[#allocation8 + $0x38] sm:$0xff]   ;;  %2877 = vst [vmem:[#allocation23_spill] sm:$0xff] %v2443_v41  ;;  %v2445_v42 = vld [vmem:[#allocation8 + $0x1c0] sm:$0xff]  }
  0x65   :  { %1578 = vmatpush3.bf16.msra.mxu0 %v2373_v10  ;;  %2874 = vst [vmem:[#allocation20_spill] sm:$0xff] %v2421_v31  ;;  %v2424_v32 = vld [vmem:[#allocation8 + $0xb0] sm:$0xff]   ;;  %2876 = vst [vmem:[#allocation22_spill] sm:$0xff] %v2435_v36  ;;  %v2438_v37 = vld [vmem:[#allocation8 + $0xb8] sm:$0xff]  }
  0x66   :  { %1600 = vmatpush3.bf16.msra.mxu1 %v2376_v11  ;;  %1579 = vmatprep.subr.bf16.mxu0 %v2379_v12  ;;  %v240_v38 = vld [vmem:[#allocation2] sm:$0xff]  ;;  %v2450_v46 = vld [vmem:[#allocation8 + $0x100] sm:$0xff]   ;;  %v2454_v51 = vld [vmem:[#allocation8 + $0x148] sm:$0xff]  }
  0x67   :  { %1601 = vmatprep.subr.bf16.mxu1 %v2382_v13  ;;  %v251_v39 = vrot.slane %v240_v38, %v2432_v35  ;;  %v244_v40 = vcombine.high %v240_v38, %v240_v38  ;;  %v2452_v49 = vld [vmem:[#allocation8 + $0x180] sm:$0xff]   ;;  %v2456_v53 = vld [vmem:[#allocation8 + $0x1c8] sm:$0xff]   ;;  %v2464_v56 = vld [vmem:[#allocation8 + $0x150] sm:$0xff]  }
  0x68   :  { %2878 = vst [vmem:[#allocation24_spill] sm:$0xff] %v2456_v53  ;;  %v2458_v54 = vld [vmem:[#allocation8 + $0x108] sm:$0xff]   ;;  %v2467_v57 = vld [vmem:[#allocation8 + $0x1d0] sm:$0xff]   ;;  %v2476_v60 = vld [vmem:[#allocation8 + $0x158] sm:$0xff]  }
  0x69   :  { %1580 = vmatpush3.bf16.msra.mxu0 %v2385_v14  ;;  %v259_v43 = vcombine.high %v251_v39, %v251_v39  ;;  %v258_v44 = vrot.slane %v244_v40, %v2432_v35  ;;  %v286_v45 = vpack.c.bf16 %v251_v39, %v251_v39  ;;  %v2461_v55 = vld [vmem:[#allocation8 + $0x188] sm:$0xff]   ;;  %2880 = vst [vmem:[#allocation26_spill] sm:$0xff] %v2467_v57  ;;  %v2470_v58 = vld [vmem:[#allocation8 + $0x110] sm:$0xff]   ;;  %v2479_v61 = vld [vmem:[#allocation8 + $0x1d8] sm:$0xff]  }
  0x6a   :  { %1602 = vmatpush3.bf16.msra.mxu1 %v2388_v15  ;;  %1581 = vmatprep.subr.bf16.mxu0 %v2391_v16  ;;  %2879 = vst [vmem:[#allocation25_spill] sm:$0xff] %v2461_v55  ;;  %v2473_v59 = vld [vmem:[#allocation8 + $0x190] sm:$0xff]   ;;  %2882 = vst [vmem:[#allocation28_spill] sm:$0xff] %v2479_v61  ;;  %v2482_v62 = vld [vmem:[#allocation8 + $0x118] sm:$0xff]  }
  0x6b   :  { %1603 = vmatprep.subr.bf16.mxu1 %v2394_v17  ;;  %v287_v47 = vpack.c.bf16 %v259_v43, %v259_v43  ;;  %v260_v48 = vcombine.high %v258_v44, %v258_v44  ;;  %v288_v50 = vpack.c.bf16 %v258_v44, %v258_v44  ;;  %2881 = vst [vmem:[#allocation27_spill] sm:$0xff] %v2473_v59  ;;  %v2485_v63 = vld [vmem:[#allocation8 + $0x198] sm:$0xff]   ;;  %v2488_v22 = vld [vmem:[#allocation8 + $0x160] sm:$0xff]   ;;  %v2500_v30 = vld [vmem:[#allocation8 + $0x168] sm:$0xff]  }
  0x6c   :  { %2883 = vst [vmem:[#allocation29_spill] sm:$0xff] %v2485_v63  ;;  %2884 = vst [vmem:[#allocation30_spill] sm:$0xff] %v2488_v22  ;;  %v2491_v23 = vld [vmem:[#allocation8 + $0x1e0] sm:$0xff]   ;;  %v2503_v38 = vld [vmem:[#allocation8 + $0x1e8] sm:$0xff]  }
  0x6d   :  { %1582 = vmatpush3.bf16.msra.mxu0 %v2397_v18  ;;  %716 = vmatprep.mubr.bf16.mxu0 %v287_v47  ;;  %v289_v52 = vpack.c.bf16 %v260_v48, %v260_v48  ;;  %2885 = vst [vmem:[#allocation31_spill] sm:$0xff] %v2491_v23  ;;  %v2494_v24 = vld [vmem:[#allocation8 + $0x120] sm:$0xff]   ;;  %2888 = vst [vmem:[#allocation34_spill] sm:$0xff] %v2500_v30  ;;  %v2506_v39 = vld [vmem:[#allocation8 + $0x128] sm:$0xff]  }
  0x6e   :  { %1604 = vmatpush3.bf16.msra.mxu1 %v2400_v19  ;;  %1583 = vmatprep.subr.bf16.mxu0 %v2403_v20  ;;  %2886 = vst [vmem:[#allocation32_spill] sm:$0xff] %v2494_v24  ;;  %v2497_v29 = vld [vmem:[#allocation8 + $0x1a0] sm:$0xff]   ;;  %2889 = vst [vmem:[#allocation35_spill] sm:$0xff] %v2503_v38  ;;  %v2509_v40 = vld [vmem:[#allocation8 + $0x1a8] sm:$0xff]  }
  0x6f   :  { %1605 = vmatprep.subr.bf16.mxu1 %v2406_v21  ;;  %756 = vmatprep.mubr.bf16.mxu1 %v289_v52  ;;  %2887 = vst [vmem:[#allocation33_spill] sm:$0xff] %v2497_v29  ;;  %2890 = vst [vmem:[#allocation36_spill] sm:$0xff] %v2506_v39  ;;  %v2512_v43 = vld [vmem:[#allocation8 + $0x170] sm:$0xff]   ;;  %v2524_v48 = vld [vmem:[#allocation8 + $0x178] sm:$0xff]  }
  0x70   :  { %2891 = vst [vmem:[#allocation37_spill] sm:$0xff] %v2509_v40  ;;  %2892 = vst [vmem:[#allocation38_spill] sm:$0xff] %v2512_v43  ;;  %v2515_v44 = vld [vmem:[#allocation8 + $0x1f0] sm:$0xff]   ;;  %v2530_v52 = vld [vmem:[#allocation8 + $0x138] sm:$0xff]  }
  0x71   :  { %1584 = vmatpush3.bf16.msra.mxu0 %v2409_v25  ;;  %2893 = vst [vmem:[#allocation39_spill] sm:$0xff] %v2515_v44  ;;  %v2521_v47 = vld [vmem:[#allocation8 + $0x1b0] sm:$0xff]   ;;  %2895 = vst [vmem:[#allocation41_spill] sm:$0xff] %v2524_v48 }
  0x72   :  { %1606 = vmatpush3.bf16.msra.mxu1 %v2412_v26  ;;  %1585 = vmatprep.subr.bf16.mxu0 %v2415_v27  ;;  %2896 = vst [vmem:[#allocation42_spill] sm:$0xff] %v2530_v52 }
  0x73   :  { %1607 = vmatprep.subr.bf16.mxu1 %v2418_v28 }
  0x75   :  { %1586 = vmatpush3.bf16.msra.mxu0 %v2421_v31 }
  0x76   :  { %1608 = vmatpush3.bf16.msra.mxu1 %v2424_v32  ;;  %1587 = vmatprep.subr.bf16.mxu0 %v2427_v33 }
  0x77   :  { %1609 = vmatprep.subr.bf16.mxu1 %v2430_v34 }
  0x79   :  { %1588 = vmatpush3.bf16.msra.mxu0 %v2435_v36 }
  0x7a   :  { %1610 = vmatpush3.bf16.msra.mxu1 %v2438_v37  ;;  %1617 = vmatprep.subr.bf16.mxu0 %v2443_v41 }
  0x7b   :  { %1639 = vmatprep.subr.bf16.mxu1 %v2445_v42 }
  0x7c   :  { %717 = vmatmul.mubr.bf16.vlgmr.msra.gmra.mrb[0].mxu0 %v286_v45  ;;  %v2518_v45 = vld [vmem:[#allocation8 + $0x130] sm:$0xff]  }
  0x7d   :  { %1618 = vmatpush3.bf16.msra.mxu0 %v2450_v46  ;;  %757 = vmatmul.mubr.bf16.vlgmr.msra.gmra.mrb[0].mxu1 %v288_v50  ;;  %2894 = vst [vmem:[#allocation40_spill] sm:$0xff] %v2518_v45  ;;  %v2527_v50 = vld [vmem:[#allocation8 + $0x1f8] sm:$0xff]  }
  0x7e   :  { %1619 = vmatprep.subr.bf16.mxu0 %v2454_v51  ;;  %1640 = vmatpush3.bf16.msra.mxu1 %v2452_v49 }
  0x7f   :  { %1641 = vmatprep.subr.bf16.mxu1 %v2456_v53 }
  0x81   :  { %1620 = vmatpush3.bf16.msra.mxu0 %v2458_v54 }
  0x82   :  { %1621 = vmatprep.subr.bf16.mxu0 %v2464_v56  ;;  %1642 = vmatpush3.bf16.msra.mxu1 %v2461_v55 }
  0x83   :  { %1643 = vmatprep.subr.bf16.mxu1 %v2467_v57 }
  0x85   :  { %1622 = vmatpush3.bf16.msra.mxu0 %v2470_v58 }
  0x86   :  { %1623 = vmatprep.subr.bf16.mxu0 %v2476_v60  ;;  %1644 = vmatpush3.bf16.msra.mxu1 %v2473_v59 }
  0x87   :  { %1645 = vmatprep.subr.bf16.mxu1 %v2479_v61 }
  0x89   :  { %1624 = vmatpush3.bf16.msra.mxu0 %v2482_v62 }
  0x8a   :  { %1625 = vmatprep.subr.bf16.mxu0 %v2488_v22  ;;  %1646 = vmatpush3.bf16.msra.mxu1 %v2485_v63 }
  0x8b   :  { %1647 = vmatprep.subr.bf16.mxu1 %v2491_v23 }
  0x8d   :  { %1626 = vmatpush3.bf16.msra.mxu0 %v2494_v24 }
  0x8e   :  { %1627 = vmatprep.subr.bf16.mxu0 %v2500_v30  ;;  %1648 = vmatpush3.bf16.msra.mxu1 %v2497_v29  ;;  %v241_v29 = vld [vmem:[#allocation2 + $0x8] sm:$0xff] }
  0x8f   :  { %1649 = vmatprep.subr.bf16.mxu1 %v2503_v38  ;;  %v2533_v38 = vld [vmem:[#allocation8 + $0x1b8] sm:$0xff]   ;;  %v268_v23 = vrot.slane %v241_v29, %v2432_v35  ;;  %v261_v63 = vcombine.high %v241_v29, %v241_v29  ;;  %v2584_v29 = vld [vmem:[#allocation10 + $0x30] sm:$0xff]  }
  0x90   :  { %2903 = vst [vmem:[#allocation49_spill] sm:$0xff] %v2584_v29 }
  0x91   :  { %1628 = vmatpush3.bf16.msra.mxu0 %v2506_v39  ;;  %v276_v61 = vcombine.high %v268_v23, %v268_v23 }
  0x92   :  { %1629 = vmatprep.subr.bf16.mxu0 %v2512_v43  ;;  %1650 = vmatpush3.bf16.msra.mxu1 %v2509_v40  ;;  %v275_v40 = vrot.slane %v261_v63, %v2432_v35  ;;  %v2575_v63 = vld [vmem:[#allocation10 + $0x20] sm:$0xff]  }
  0x93   :  { %1651 = vmatprep.subr.bf16.mxu1 %v2515_v44  ;;  %v290_v44 = vpack.c.bf16 %v268_v23, %v268_v23  ;;  %v291_v59 = vpack.c.bf16 %v276_v61, %v276_v61  ;;  %v2571_v61 = vld [vmem:[#allocation10 + $0x18] sm:$0xff]   ;;  %2901 = vst [vmem:[#allocation47_spill] sm:$0xff] %v2575_v63  ;;  %v2580_v23 = vld [vmem:[#allocation10 + $0x28] sm:$0xff]  }
  0x94   :  { %v277_v57 = vcombine.high %v275_v40, %v275_v40  ;;  %v292_v55 = vpack.c.bf16 %v275_v40, %v275_v40  ;;  %2900 = vst [vmem:[#allocation46_spill] sm:$0xff] %v2571_v61  ;;  %2902 = vst [vmem:[#allocation48_spill] sm:$0xff] %v2580_v23  ;;  %v2588_v40 = vld [vmem:[#allocation10 + $0x38] sm:$0xff]  }
  0x95   :  { %1630 = vmatpush3.bf16.msra.mxu0 %v2518_v45  ;;  %796 = vmatprep.mubr.bf16.mxu0 %v291_v59  ;;  %v2567_v59 = vld [vmem:[#allocation10 + $0x10] sm:$0xff]   ;;  %2904 = vst [vmem:[#allocation50_spill] sm:$0xff] %v2588_v40 }
  0x96   :  { %1631 = vmatprep.subr.bf16.mxu0 %v2524_v48  ;;  %1652 = vmatpush3.bf16.msra.mxu1 %v2521_v47  ;;  %v293_v53 = vpack.c.bf16 %v277_v57, %v277_v57  ;;  %v2563_v57 = vld [vmem:[#allocation10 + $0x8] sm:$0xff]   ;;  %2899 = vst [vmem:[#allocation45_spill] sm:$0xff] %v2567_v59 }
  0x97   :  { %1653 = vmatprep.subr.bf16.mxu1 %v2527_v50  ;;  %2898 = vst [vmem:[#allocation44_spill] sm:$0xff] %v2563_v57 }
  0x98   :  { %836 = vmatprep.mubr.bf16.mxu1 %v293_v53  ;;  %v2559_v53 = vld [vmem:[#allocation10] sm:$0xff]  }
  0x99   :  { %1632 = vmatpush3.bf16.msra.mxu0 %v2530_v52  ;;  %2897 = vst [vmem:[#allocation43_spill] sm:$0xff] %v2559_v53 }
  0x9a   :  { %1654 = vmatpush3.bf16.msra.mxu1 %v2533_v38 }
  0x9b   :  { %1670 = vmatprep.subr.bf16.mxu1 %v2344_v0 }
  0x9c   :  { %797 = vmatmul.mubr.bf16.vlgmr.msra.gmra.mrb[4].mxu0 %v290_v44  ;;  %v2590_v44 = vld [vmem:[#allocation5] sm:$0xff] }
  0x9d   :  { %837 = vmatmul.mubr.bf16.vlgmr.msra.gmra.mrb[4].mxu1 %v292_v55  ;;  %v2855_v55 = vmov 0.0  }
  0x9e   :  { %1671 = vmatpush3.bf16.msra.mxu1 %v2349_v2  ;;  %1864 = vmatprep.subr.bf16.mxu0 %v2855_v55 }
  0x9f   :  { %1672 = vmatprep.subr.bf16.mxu1 %v2355_v4  ;;  %1865 = vmatpush3.bf16.msra.mxu0 %v2559_v53 }
  0xa0   :  { %1866 = vmatprep.subr.bf16.mxu0 %v2855_v55  ;;  %1880 = vmatprep.mubr.msk.bf16.mxu0 %vm2217_vm0, %v2855_v55 }
  0xa2   :  { %1673 = vmatpush3.bf16.msra.mxu1 %v2361_v6 }
  0xa3   :  { %1674 = vmatprep.subr.bf16.mxu1 %v2367_v8  ;;  %1867 = vmatpush3.bf16.msra.mxu0 %v2563_v57 }
  0xa4   :  { %1868 = vmatprep.subr.bf16.mxu0 %v2855_v55 }
  0xa6   :  { %1675 = vmatpush3.bf16.msra.mxu1 %v2373_v10 }
  0xa7   :  { %1676 = vmatprep.subr.bf16.mxu1 %v2379_v12  ;;  %1869 = vmatpush3.bf16.msra.mxu0 %v2567_v59 }
  0xa8   :  { %1870 = vmatprep.subr.bf16.mxu0 %v2855_v55 }
  0xaa   :  { %1677 = vmatpush3.bf16.msra.mxu1 %v2385_v14 }
  0xab   :  { %1678 = vmatprep.subr.bf16.mxu1 %v2391_v16  ;;  %1871 = vmatpush3.bf16.msra.mxu0 %v2571_v61 }
  0xac   :  { %1872 = vmatprep.subr.bf16.mxu0 %v2855_v55 }
  0xae   :  { %1679 = vmatpush3.bf16.msra.mxu1 %v2397_v18 }
  0xaf   :  { %1680 = vmatprep.subr.bf16.mxu1 %v2403_v20  ;;  %1873 = vmatpush3.bf16.msra.mxu0 %v2575_v63 }
  0xb0   :  { %1874 = vmatprep.subr.bf16.mxu0 %v2855_v55 }
  0xb2   :  { %1681 = vmatpush3.bf16.msra.mxu1 %v2409_v25 }
  0xb3   :  { %1682 = vmatprep.subr.bf16.mxu1 %v2415_v27  ;;  %1875 = vmatpush3.bf16.msra.mxu0 %v2580_v23 }
  0xb4   :  { %1876 = vmatprep.subr.bf16.mxu0 %v2855_v55 }
  0xb6   :  { %1683 = vmatpush3.bf16.msra.mxu1 %v2421_v31 }
  0xb7   :  { %1684 = vmatprep.subr.bf16.mxu1 %v2427_v33  ;;  %1877 = vmatpush3.bf16.msra.mxu0 %v2584_v29 }
  0xb8   :  { %1878 = vmatprep.subr.bf16.mxu0 %v2855_v55 }
  0xba   :  { %1685 = vmatpush3.bf16.msra.mxu1 %v2435_v36 }
  0xbb   :  { %1714 = vmatprep.subr.bf16.mxu1 %v2443_v41  ;;  %v952_v41 = vrot.slane %v2590_v44, %v2432_v35  ;;  %1879 = vmatpush3.bf16.msra.mxu0 %v2588_v40 }
  0xbc   :  { %1692 = vmatprep.subr.bf16.mxu0 %v2346_v1 }
  0xbd   :  { %v960_v36 = vcombine.high %v952_v41, %v952_v41  ;;  %v987_v31 = vpack.c.bf16 %v952_v41, %v952_v41 }
  0xbf   :  { %v988_v33 = vpack.c.bf16 %v960_v36, %v960_v36 }
  0xc1   :  { %1027 = vmatprep.mubr.bf16.mxu1 %v988_v33 }
  0xc2   :  { %1028 = vmatmul.mubr.bf16.vlgmr.msra.gmra.mrb[8].mxu1 %v987_v31  ;;  %v2610_v31 = vld [vmem:[#allocation5 + $0x8] sm:$0xff] }
  0xc3   :  { %1715 = vmatpush3.bf16.msra.mxu1 %v2450_v46  ;;  %v969_v33 = vrot.slane %v2610_v31, %v2432_v35 }
  0xc4   :  { %1716 = vmatprep.subr.bf16.mxu1 %v2454_v51 }
  0xc5   :  { %v977_v36 = vcombine.high %v969_v33, %v969_v33  ;;  %v991_v55 = vpack.c.bf16 %v969_v33, %v969_v33  ;;  %v2639_v33 = vld [vmem:[%s2823_s4] ss:$0 sm:$0xff] }
  0xc7   :  { %1717 = vmatpush3.bf16.msra.mxu1 %v2458_v54  ;;  %v992_v41 = vpack.c.bf16 %v977_v36, %v977_v36 }
  0xc8   :  { %1718 = vmatprep.subr.bf16.mxu1 %v2464_v56 }
  0xc9   :  { %1107 = vmatprep.mubr.bf16.mxu1 %v992_v41 }
  0xcb   :  { %1719 = vmatpush3.bf16.msra.mxu1 %v2470_v58 }
  0xcc   :  { %1720 = vmatprep.subr.bf16.mxu1 %v2476_v60 }
  0xcf   :  { %1721 = vmatpush3.bf16.msra.mxu1 %v2482_v62 }
  0xd0   :  { %1722 = vmatprep.subr.bf16.mxu1 %v2488_v22 }
  0xd3   :  { %1723 = vmatpush3.bf16.msra.mxu1 %v2494_v24 }
  0xd4   :  { %1724 = vmatprep.subr.bf16.mxu1 %v2500_v30  ;;  %v2905_v30 = vmov 0.0  }
  0xd7   :  { %1725 = vmatpush3.bf16.msra.mxu1 %v2506_v39 }
  0xd8   :  { %1726 = vmatprep.subr.bf16.mxu1 %v2512_v43 }
  0xdb   :  { %1727 = vmatpush3.bf16.msra.mxu1 %v2518_v45 }
  0xdc   :  { %1728 = vmatprep.subr.bf16.mxu1 %v2524_v48 }
  0xdf   :  { %1729 = vmatpush3.bf16.msra.mxu1 %v2530_v52 }
  0xe0   :  { %1884 = vmatprep.subr.bf16.mxu1 %v2905_v30 }
  0xe2   :  { %1108 = vmatmul.mubr.bf16.vlgmr.msra.gmra.mrb[12].mxu1 %v991_v55 }
  0xe3   :  { %1885 = vmatpush3.bf16.msra.mxu1 %v2559_v53  ;;  %1900 = vmatprep.mubr.msk.bf16.mxu1 %vm2217_vm0, %v2905_v30 }
  0xe4   :  { %1886 = vmatprep.subr.bf16.mxu1 %v2905_v30 }
  0xe7   :  { %1887 = vmatpush3.bf16.msra.mxu1 %v2563_v57 }
  0xe8   :  { %1888 = vmatprep.subr.bf16.mxu1 %v2905_v30 }
  0xeb   :  { %1889 = vmatpush3.bf16.msra.mxu1 %v2567_v59 }
  0xec   :  { %1890 = vmatprep.subr.bf16.mxu1 %v2905_v30 }
  0xef   :  { %1891 = vmatpush3.bf16.msra.mxu1 %v2571_v61 }
  0xf0   :  { %1892 = vmatprep.subr.bf16.mxu1 %v2905_v30 }
  0xf3   :  { %1893 = vmatpush3.bf16.msra.mxu1 %v2575_v63 }
  0xf4   :  { %1894 = vmatprep.subr.bf16.mxu1 %v2905_v30 }
  0xf7   :  { %1895 = vmatpush3.bf16.msra.mxu1 %v2580_v23 }
  0xf8   :  { %1896 = vmatprep.subr.bf16.mxu1 %v2905_v30 }
  0xfb   :  { %1897 = vmatpush3.bf16.msra.mxu1 %v2584_v29 }
  0xfc   :  { %1898 = vmatprep.subr.bf16.mxu1 %v2905_v30 }
  0xff   :  { %1899 = vmatpush3.bf16.msra.mxu1 %v2588_v40 }
 0x100   :  { %1789 = vmatprep.subr.bf16.mxu1 %v2346_v1  ;;  %v945_v1 = vcombine.high %v2590_v44, %v2590_v44  ;;  %v2916_v44 = vld [vmem:[#allocation39_spill] sm:$0xff] }
 0x102   :  { %v959_v45 = vrot.slane %v945_v1, %v2432_v35  ;;  %v2700_v1 = vld [vmem:[#allocation7] sm:$0xff] }
 0x14f   :  { %v1589_v55 = vpop.f32.mrb[0].mxu0 }
 0x150   :  { %v1590_v36 = vpop.f32.mrb[1].mxu0  ;;  %v1611_v41 = vpop.f32.mrb[0].mxu1 }
 0x151   :  { %v1591_v63 = vadd.f32 %v1590_v36, %v1589_v55  ;;  %v1592_v23 = vpop.f32.mrb[2].mxu0  ;;  %v1612_v61 = vpop.f32.mrb[1].mxu1 }
 0x152   :  { %v1593_v59 = vpop.f32.mrb[3].mxu0  ;;  %v1613_v57 = vadd.f32 %v1612_v61, %v1611_v41  ;;  %v1614_v53 = vpop.f32.mrb[2].mxu1  ;;  %v961_v61 = vcombine.high %v959_v45, %v959_v45 }
 0x153   :  { %v719_v29 = vadd.f32 %v1591_v63, %v2639_v33  ;;  %v1615_v30 = vpop.f32.mrb[3].mxu1 }
 0x155   :  { %v759_v40 = vadd.f32 %v1613_v57, %v719_v29  ;;  %v990_v57 = vpack.c.bf16 %v961_v61, %v961_v61  ;;  %v2922_v61 = vld [vmem:[#allocation32_spill] sm:$0xff] }
 0x16f   :  { %v1633_v52 = vpop.f32.mrb[4].mxu0 }
 0x170   :  { %v1634_v48 = vpop.f32.mrb[5].mxu0  ;;  %v1655_v43 = vpop.f32.mrb[4].mxu1 }
 0x171   :  { %v1635_v39 = vadd.f32 %v1634_v48, %v1633_v52  ;;  %v1636_v24 = vpop.f32.mrb[6].mxu0  ;;  %v1656_v55 = vpop.f32.mrb[5].mxu1  ;;  %v2913_v48 = vld [vmem:[#allocation33_spill] sm:$0xff]  ;;  %v2914_v52 = vld [vmem:[#allocation35_spill] sm:$0xff] }
 0x172   :  { %v1637_v23 = vpop.f32.mrb[7].mxu0  ;;  %v1657_v59 = vadd.f32 %v1656_v55, %v1655_v43  ;;  %v1658_v22 = vpop.f32.mrb[6].mxu1  ;;  %v2909_v24 = vld [vmem:[#allocation27_spill] sm:$0xff]  ;;  %v2911_v43 = vld [vmem:[#allocation29_spill] sm:$0xff]  ;;  %v1209_v55 = vrot.slane %v2700_v1, %v2432_v35 }
 0x173   :  { %v799_v36 = vadd.f32 %v1635_v39, %v759_v40  ;;  %v1659_v63 = vpop.f32.mrb[7].mxu1  ;;  %v2908_v22 = vld [vmem:[#allocation26_spill] sm:$0xff]  ;;  %v2910_v39 = vld [vmem:[#allocation28_spill] sm:$0xff]  ;;  %v2915_v40 = vld [vmem:[#allocation37_spill] sm:$0xff] }
 0x174   :  { %v1217_v23 = vcombine.high %v1209_v55, %v1209_v55  ;;  %v2921_v63 = vld [vmem:[#allocation30_spill] sm:$0xff] }
 0x175   :  { %v839_v53 = vadd.f32 %v1657_v59, %v799_v36  ;;  %v1244_v59 = vpack.c.bf16 %v1209_v55, %v1209_v55 }
 0x176   :  { %v1245_v36 = vpack.c.bf16 %v1217_v23, %v1217_v23 }
 0x177   :  { %v844_v30 = vmax.f32 %v839_v53, 0.0  ;;  %v2923_v53 = vld [vmem:[#allocation34_spill] sm:$0xff] }
 0x179   :  { %v845_v29 = vpack.c.bf16 %v844_v30, %v844_v30  ;;  %v2924_v30 = vld [vmem:[#allocation36_spill] sm:$0xff] }
 0x17b   :  { %1881 = vmatmul.mubr.bf16.vlgmr.msra.gmra.mrb[8].mxu0 %v845_v29 }
 0x17c   :  { %1693 = vmatpush3.bf16.msra.mxu0 %v2352_v3  ;;  %1067 = vmatprep.mubr.bf16.mxu0 %v990_v57  ;;  %v962_v3 = vcombine.high %v2610_v31, %v2610_v31  ;;  %v2928_v57 = vld [vmem:[#allocation42_spill] sm:$0xff] }
 0x17d   :  { %1694 = vmatprep.subr.bf16.mxu0 %v2358_v5 }
 0x17e   :  { %v976_v5 = vrot.slane %v962_v3, %v2432_v35  ;;  %v2929_v3 = vmov 0.0  }
 0x180   :  { %1695 = vmatpush3.bf16.msra.mxu0 %v2364_v7  ;;  %v978_v7 = vcombine.high %v976_v5, %v976_v5  ;;  %v993_v31 = vpack.c.bf16 %v976_v5, %v976_v5  ;;  %v2930_v5 = vld [vmem:[#allocation43_spill] sm:$0xff] }
 0x181   :  { %1696 = vmatprep.subr.bf16.mxu0 %v2370_v9  ;;  %v989_v9 = vpack.c.bf16 %v959_v45, %v959_v45  ;;  %v2912_v45 = vld [vmem:[#allocation31_spill] sm:$0xff] }
 0x184   :  { %1697 = vmatpush3.bf16.msra.mxu0 %v2376_v11  ;;  %v994_v11 = vpack.c.bf16 %v978_v7, %v978_v7  ;;  %v2931_v7 = vld [vmem:[#allocation44_spill] sm:$0xff] }
 0x185   :  { %1698 = vmatprep.subr.bf16.mxu0 %v2382_v13  ;;  %v2906_v13 = vld [vmem:[#allocation24_spill] sm:$0xff] }
 0x188   :  { %1699 = vmatpush3.bf16.msra.mxu0 %v2388_v15  ;;  %v2907_v15 = vld [vmem:[#allocation25_spill] sm:$0xff] }
 0x189   :  { %1700 = vmatprep.subr.bf16.mxu0 %v2394_v17 }
 0x18c   :  { %1701 = vmatpush3.bf16.msra.mxu0 %v2400_v19 }
 0x18d   :  { %1702 = vmatprep.subr.bf16.mxu0 %v2406_v21 }
 0x190   :  { %1703 = vmatpush3.bf16.msra.mxu0 %v2412_v26 }
 0x191   :  { %1704 = vmatprep.subr.bf16.mxu0 %v2418_v28 }
 0x194   :  { %1705 = vmatpush3.bf16.msra.mxu0 %v2424_v32 }
 0x195   :  { %1706 = vmatprep.subr.bf16.mxu0 %v2430_v34 }
 0x198   :  { %1707 = vmatpush3.bf16.msra.mxu0 %v2438_v37 }
 0x199   :  { %1736 = vmatprep.subr.bf16.mxu0 %v2445_v42 }
 0x19b   :  { %1068 = vmatmul.mubr.bf16.vlgmr.msra.gmra.mrb[12].mxu0 %v989_v9  ;;  %v2932_v9 = vld [vmem:[#allocation45_spill] sm:$0xff] }
 0x19c   :  { %1737 = vmatpush3.bf16.msra.mxu0 %v2452_v49  ;;  %1147 = vmatprep.mubr.bf16.mxu0 %v994_v11  ;;  %v2933_v11 = vld [vmem:[#allocation46_spill] sm:$0xff] }
 0x19d   :  { %1738 = vmatprep.subr.bf16.mxu0 %v2906_v13 }
 0x1a0   :  { %1739 = vmatpush3.bf16.msra.mxu0 %v2907_v15 }
 0x1a1   :  { %1740 = vmatprep.subr.bf16.mxu0 %v2908_v22 }
 0x1a4   :  { %1741 = vmatpush3.bf16.msra.mxu0 %v2909_v24 }
 0x1a5   :  { %1742 = vmatprep.subr.bf16.mxu0 %v2910_v39 }
 0x1a8   :  { %1743 = vmatpush3.bf16.msra.mxu0 %v2911_v43 }
 0x1a9   :  { %1744 = vmatprep.subr.bf16.mxu0 %v2912_v45 }
 0x1ac   :  { %1745 = vmatpush3.bf16.msra.mxu0 %v2913_v48 }
 0x1ad   :  { %1746 = vmatprep.subr.bf16.mxu0 %v2914_v52 }
 0x1b0   :  { %1747 = vmatpush3.bf16.msra.mxu0 %v2915_v40 }
 0x1b1   :  { %1748 = vmatprep.subr.bf16.mxu0 %v2916_v44 }
 0x1b4   :  { %1749 = vmatpush3.bf16.msra.mxu0 %v2521_v47 }
 0x1b5   :  { %1750 = vmatprep.subr.bf16.mxu0 %v2527_v50 }
 0x1b8   :  { %1751 = vmatpush3.bf16.msra.mxu0 %v2533_v38 }
 0x1b9   :  { %1767 = vmatprep.subr.bf16.mxu0 %v2344_v0  ;;  %v1686_v0 = vpop.f32.mrb[8].mxu1 }
 0x1bb   :  { %1148 = vmatmul.mubr.bf16.vlgmr.msra.gmra.mrb[16].mxu0 %v993_v31  ;;  %v2737_v31 = vld [vmem:[%s2825_s6] ss:$0 sm:$0xff]  ;;  %s2218_s6 = smov [#allocation12]  }
 0x1bc   :  { %1768 = vmatpush3.bf16.msra.mxu0 %v2349_v2  ;;  %v1687_v2 = vpop.f32.mrb[9].mxu1  ;;  %1284 = vmatprep.mubr.bf16.mxu0 %v1245_v36  ;;  %s1471_s25 = sshll.u32 %s2218_s6, 4  ;;  %s1472_s25 = int_to_ptr.vmem [resolvable:$true] %s1471_s25 }
 0x1bd   :  { %1769 = vmatprep.subr.bf16.mxu0 %v2355_v4  ;;  %v2692_v4 = vadd.f32 %v1687_v2, %v1686_v0  ;;  %v2934_v0 = vld [vmem:[#allocation47_spill] sm:$0xff]  ;;  %s2132_s28 = scalar_lea.vmem %s1472_s25, 32  ;;  %p2137_p13 = scmp.lt.s32.totalorder %s1472_s25, %s1472_s25 }
 0x1be   :  { %p2133_p12 = scmp.ne.s32.totalorder %s1472_s25, %s2132_s28  ;;  %p2138_p0 = scmp.lt.s32.totalorder %s2132_s28, %s2132_s28 }
 0x1c0   :  { %1770 = vmatpush3.bf16.msra.mxu0 %v2361_v6  ;;  %v1689_v6 = vpop.f32.mrb[10].mxu1  ;;  %p2139_p1 = por %p2138_p0, %p2137_p13 }
 0x1c1   :  { %1771 = vmatprep.subr.bf16.mxu0 %v2367_v8  ;;  %v2917_v8 = vld [vmem:[#allocation20_spill] sm:$0xff] }
 0x1c2   :  { %p2140_p2 = pnand %p2139_p1, %p2133_p12 }
 0x1c4   :  { %1772 = vmatpush3.bf16.msra.mxu0 %v2373_v10  ;;  %v1690_v10 = vpop.f32.mrb[11].mxu1 }
 0x1c5   :  { %1773 = vmatprep.subr.bf16.mxu0 %v2379_v12  ;;  %v2918_v12 = vld [vmem:[#allocation21_spill] sm:$0xff] }
 0x1c8   :  { %1774 = vmatpush3.bf16.msra.mxu0 %v2385_v14  ;;  %v2919_v14 = vld [vmem:[#allocation22_spill] sm:$0xff] }
 0x1c9   :  { %1775 = vmatprep.subr.bf16.mxu0 %v2391_v16  ;;  %v2920_v16 = vld [vmem:[#allocation23_spill] sm:$0xff] }
 0x1cc   :  { %1776 = vmatpush3.bf16.msra.mxu0 %v2397_v18  ;;  %v1730_v18 = vpop.f32.mrb[12].mxu1 }
 0x1cd   :  { %1777 = vmatprep.subr.bf16.mxu0 %v2403_v20  ;;  %v1731_v20 = vpop.f32.mrb[13].mxu1 }
 0x1ce   :  { %v2698_v41 = vadd.f32 %v1731_v20, %v1730_v18  ;;  %v2937_v18 = vld [vmem:[#allocation50_spill] sm:$0xff]  ;;  %v1030_v20 = vadd.f32 %v2692_v4, %v2639_v33 }
 0x1d0   :  { %1778 = vmatpush3.bf16.msra.mxu0 %v2409_v25  ;;  %v1733_v25 = vpop.f32.mrb[14].mxu1 }
 0x1d1   :  { %1779 = vmatprep.subr.bf16.mxu0 %v2415_v27  ;;  %v1734_v27 = vpop.f32.mrb[15].mxu1 }
 0x1d4   :  { %1780 = vmatpush3.bf16.msra.mxu0 %v2917_v8 }
 0x1d5   :  { %1781 = vmatprep.subr.bf16.mxu0 %v2918_v12  ;;  %v2935_v12 = vld [vmem:[#allocation48_spill] sm:$0xff] }
 0x1d8   :  { %1782 = vmatpush3.bf16.msra.mxu0 %v2919_v14 }
 0x1d9   :  { %1811 = vmatprep.subr.bf16.mxu0 %v2920_v16  ;;  %v2936_v16 = vld [vmem:[#allocation49_spill] sm:$0xff] }
 0x1db   :  { %1285 = vmatmul.mubr.bf16.vlgmr.msra.gmra.mrb[20].mxu0 %v1244_v59 }
 0x1dc   :  { %1812 = vmatpush3.bf16.msra.mxu0 %v2450_v46  ;;  %v2925_v46 = vld [vmem:[#allocation38_spill] sm:$0xff] }
 0x1dd   :  { %1813 = vmatprep.subr.bf16.mxu0 %v2454_v51  ;;  %v2716_v51 = vld [vmem:[#allocation7 + $0x8] sm:$0xff] }
 0x1e0   :  { %1814 = vmatpush3.bf16.msra.mxu0 %v2458_v54  ;;  %v1226_v54 = vrot.slane %v2716_v51, %v2432_v35 }
 0x1e1   :  { %1815 = vmatprep.subr.bf16.mxu0 %v2464_v56  ;;  %v2926_v56 = vld [vmem:[#allocation40_spill] sm:$0xff] }
 0x1e2   :  { %v1248_v29 = vpack.c.bf16 %v1226_v54, %v1226_v54 }
 0x1e4   :  { %1816 = vmatpush3.bf16.msra.mxu0 %v2470_v58  ;;  %v2927_v58 = vld [vmem:[#allocation41_spill] sm:$0xff] }
 0x1e5   :  { %1817 = vmatprep.subr.bf16.mxu0 %v2476_v60  ;;  %v1234_v60 = vcombine.high %v1226_v54, %v1226_v54 }
 0x1e8   :  { %1818 = vmatpush3.bf16.msra.mxu0 %v2482_v62  ;;  %v1249_v62 = vpack.c.bf16 %v1234_v60, %v1234_v60 }
 0x1e9   :  { %1819 = vmatprep.subr.bf16.mxu0 %v2921_v63 }
 0x1ea   :  { %1364 = vmatprep.mubr.bf16.mxu0 %v1249_v62 }
 0x1ec   :  { %1820 = vmatpush3.bf16.msra.mxu0 %v2922_v61  ;;  %v1202_v61 = vcombine.high %v2700_v1, %v2700_v1  ;;  %v2018_v1 = vld [vmem:[#allocation8 + $0xd0] sm:$0xff]  }
 0x1ed   :  { %1821 = vmatprep.subr.bf16.mxu0 %v2923_v53 }
 0x1ee   :  { %v1216_v53 = vrot.slane %v1202_v61, %v2432_v35 }
 0x1f0   :  { %1822 = vmatpush3.bf16.msra.mxu0 %v2924_v30  ;;  %v1218_v60 = vcombine.high %v1216_v53, %v1216_v53 }
 0x1f1   :  { %1823 = vmatprep.subr.bf16.mxu0 %v2925_v46 }
 0x1f4   :  { %1824 = vmatpush3.bf16.msra.mxu0 %v2926_v56 }
 0x1f5   :  { %1825 = vmatprep.subr.bf16.mxu0 %v2927_v58 }
 0x1f8   :  { %1826 = vmatpush3.bf16.msra.mxu0 %v2928_v57  ;;  %v1247_v57 = vpack.c.bf16 %v1218_v60, %v1218_v60 }
 0x1f9   :  { %1904 = vmatprep.subr.bf16.mxu0 %v2929_v3 }
 0x1fb   :  { %1365 = vmatmul.mubr.bf16.vlgmr.msra.gmra.mrb[24].mxu0 %v1248_v29 }
 0x1fc   :  { %1905 = vmatpush3.bf16.msra.mxu0 %v2930_v5  ;;  %1920 = vmatprep.mubr.msk.bf16.mxu0 %vm2217_vm0, %v2929_v3  ;;  %v2017_v5 = vld [vmem:[#allocation8 + $0x88] sm:$0xff]  }
 0x1fd   :  { %1906 = vmatprep.subr.bf16.mxu0 %v2929_v3 }
 0x200   :  { %1907 = vmatpush3.bf16.msra.mxu0 %v2931_v7  ;;  %v2019_v7 = vld [vmem:[#allocation8 + $0x90] sm:$0xff]  }
 0x201   :  { %1908 = vmatprep.subr.bf16.mxu0 %v2929_v3 }
 0x204   :  { %1909 = vmatpush3.bf16.msra.mxu0 %v2932_v9  ;;  %v2020_v9 = vld [vmem:[#allocation8 + $0xd8] sm:$0xff]  }
 0x205   :  { %1910 = vmatprep.subr.bf16.mxu0 %v2929_v3 }
 0x208   :  { %1911 = vmatpush3.bf16.msra.mxu0 %v2933_v11  ;;  %v2021_v11 = vld [vmem:[#allocation8 + $0x98] sm:$0xff]  }
 0x209   :  { %1912 = vmatprep.subr.bf16.mxu0 %v2929_v3 }
 0x20c   :  { %1913 = vmatpush3.bf16.msra.mxu0 %v2934_v0  ;;  %v1219_v0 = vcombine.high %v2716_v51, %v2716_v51 }
 0x20d   :  { %1914 = vmatprep.subr.bf16.mxu0 %v2929_v3 }
 0x210   :  { %1915 = vmatpush3.bf16.msra.mxu0 %v2935_v12 }
 0x211   :  { %1916 = vmatprep.subr.bf16.mxu0 %v2929_v3 }
 0x214   :  { %1917 = vmatpush3.bf16.msra.mxu0 %v2936_v16 }
 0x215   :  { %1918 = vmatprep.subr.bf16.mxu0 %v2929_v3  ;;  %v2015_v3 = vld [vmem:[#allocation8 + $0x80] sm:$0xff]  }
 0x218   :  { %1919 = vmatpush3.bf16.msra.mxu0 %v2937_v18 }
 0x24e   :  { %v934_v2 = vpop.f32.mrb[8].mxu0 }
 0x24f   :  { %v935_v6 = vadd.f32 %v2737_v31, %v934_v2  ;;  %v1882_v8 = vpop.f32.mrb[9].mxu0  ;;  %v1233_v2 = vrot.slane %v1219_v0, %v2432_v35 }
 0x250   :  { %v937_v10 = vpop.f32.mrb[10].mxu0  ;;  %v1246_v8 = vpack.c.bf16 %v1216_v53, %v1216_v53 }
 0x251   :  { %940 = vst [vmem:[#allocation11] sm:$0x3] %v935_v6  ;;  %v1883_v14 = vpop.f32.mrb[11].mxu0  ;;  %v1235_v6 = vcombine.high %v1233_v2, %v1233_v2 }
 0x26e   :  { %v1708_v25 = vpop.f32.mrb[12].mxu0 }
 0x26f   :  { %v1709_v27 = vpop.f32.mrb[13].mxu0 }
 0x270   :  { %v1710_v55 = vadd.f32 %v1709_v27, %v1708_v25  ;;  %v1711_v23 = vpop.f32.mrb[14].mxu0 }
 0x271   :  { %v1712_v36 = vpop.f32.mrb[15].mxu0 }
 0x272   :  { %v1070_v59 = vadd.f32 %v1710_v55, %v1030_v20 }
 0x274   :  { %v1110_v63 = vadd.f32 %v2698_v41, %v1070_v59  ;;  %v2016_v41 = vld [vmem:[#allocation8 + $0xc8] sm:$0xff]  }
 0x28e   :  { %v1752_v30 = vpop.f32.mrb[16].mxu0 }
 0x28f   :  { %v1753_v46 = vpop.f32.mrb[17].mxu0 }
 0x290   :  { %v1754_v54 = vadd.f32 %v1753_v46, %v1752_v30  ;;  %v1755_v56 = vpop.f32.mrb[18].mxu0 }
 0x291   :  { %v1756_v58 = vpop.f32.mrb[19].mxu0 }
 0x292   :  { %v1150_v4 = vadd.f32 %v1754_v54, %v1110_v63 }
 0x294   :  { %v1155_v62 = vmax.f32 %v1150_v4, 0.0 }
 0x296   :  { %v1156_v29 = vpack.c.bf16 %v1155_v62, %v1155_v62 }
 0x298   :  { %1901 = vmatmul.mubr.bf16.vlgmr.msra.gmra.mrb[16].mxu1 %v1156_v29 }
 0x299   :  { %1790 = vmatpush3.bf16.msra.mxu1 %v2015_v3  ;;  %1324 = vmatprep.mubr.bf16.mxu1 %v1247_v57 }
 0x29a   :  { %1791 = vmatprep.subr.bf16.mxu1 %v2016_v41 }
 0x29d   :  { %1792 = vmatpush3.bf16.msra.mxu1 %v2017_v5 }
 0x29e   :  { %1793 = vmatprep.subr.bf16.mxu1 %v2018_v1 }
 0x2a1   :  { %1794 = vmatpush3.bf16.msra.mxu1 %v2019_v7 }
 0x2a2   :  { %1795 = vmatprep.subr.bf16.mxu1 %v2020_v9 }
 0x2a5   :  { %1796 = vmatpush3.bf16.msra.mxu1 %v2021_v11 }
 0x2a6   :  { %1797 = vmatprep.subr.bf16.mxu1 %v2394_v17  ;;  %v1251_v17 = vpack.c.bf16 %v1235_v6, %v1235_v6 }
 0x2a9   :  { %1798 = vmatpush3.bf16.msra.mxu1 %v2400_v19  ;;  %v1250_v19 = vpack.c.bf16 %v1233_v2, %v1233_v2 }
 0x2aa   :  { %1799 = vmatprep.subr.bf16.mxu1 %v2406_v21 }
 0x2ad   :  { %1800 = vmatpush3.bf16.msra.mxu1 %v2412_v26 }
 0x2ae   :  { %1801 = vmatprep.subr.bf16.mxu1 %v2418_v28  ;;  %v1783_v21 = vpop.f32.mrb[20].mxu0 }
 0x2af   :  { %v1784_v26 = vpop.f32.mrb[21].mxu0 }
 0x2b0   :  { %v1785_v28 = vadd.f32 %v1784_v26, %v1783_v21 }
 0x2b1   :  { %1802 = vmatpush3.bf16.msra.mxu1 %v2424_v32  ;;  %v1786_v32 = vpop.f32.mrb[22].mxu0 }
 0x2b2   :  { %1803 = vmatprep.subr.bf16.mxu1 %v2430_v34  ;;  %v1787_v34 = vpop.f32.mrb[23].mxu0 }
 0x2b5   :  { %1804 = vmatpush3.bf16.msra.mxu1 %v2438_v37 }
 0x2b6   :  { %1833 = vmatprep.subr.bf16.mxu1 %v2445_v42 }
 0x2b8   :  { %1325 = vmatmul.mubr.bf16.vlgmr.msra.gmra.mrb[20].mxu1 %v1246_v8 }
 0x2b9   :  { %1834 = vmatpush3.bf16.msra.mxu1 %v2452_v49  ;;  %1404 = vmatprep.mubr.bf16.mxu1 %v1251_v17 }
 0x2ba   :  { %1835 = vmatprep.subr.bf16.mxu1 %v2906_v13 }
 0x2bd   :  { %1836 = vmatpush3.bf16.msra.mxu1 %v2907_v15 }
 0x2be   :  { %1837 = vmatprep.subr.bf16.mxu1 %v2908_v22 }
 0x2c1   :  { %1838 = vmatpush3.bf16.msra.mxu1 %v2909_v24 }
 0x2c2   :  { %1839 = vmatprep.subr.bf16.mxu1 %v2910_v39 }
 0x2c5   :  { %1840 = vmatpush3.bf16.msra.mxu1 %v2911_v43 }
 0x2c6   :  { %1841 = vmatprep.subr.bf16.mxu1 %v2912_v45 }
 0x2c9   :  { %1842 = vmatpush3.bf16.msra.mxu1 %v2913_v48 }
 0x2ca   :  { %1843 = vmatprep.subr.bf16.mxu1 %v2914_v52 }
 0x2cd   :  { %1844 = vmatpush3.bf16.msra.mxu1 %v2915_v40 }
 0x2ce   :  { %1845 = vmatprep.subr.bf16.mxu1 %v2916_v44  ;;  %v1827_v35 = vpop.f32.mrb[24].mxu0 }
 0x2cf   :  { %v1828_v37 = vpop.f32.mrb[25].mxu0 }
 0x2d0   :  { %v1829_v42 = vadd.f32 %v1828_v37, %v1827_v35  ;;  %v1830_v49 = vpop.f32.mrb[26].mxu0 }
 0x2d1   :  { %1846 = vmatpush3.bf16.msra.mxu1 %v2521_v47  ;;  %v1831_v13 = vpop.f32.mrb[27].mxu0 }
 0x2d2   :  { %1847 = vmatprep.subr.bf16.mxu1 %v2527_v50 }
 0x2d5   :  { %1848 = vmatpush3.bf16.msra.mxu1 %v2533_v38  ;;  %v1287_v38 = vadd.f32 %v1785_v28, %v2639_v33 }
 0x2d8   :  { %1405 = vmatmul.mubr.bf16.vlgmr.msra.gmra.mrb[24].mxu1 %v1250_v19 }
 0x36b   :  { %v1191_v15 = vpop.f32.mrb[16].mxu1 }
 0x36c   :  { %v1192_v22 = vadd.f32 %v2737_v31, %v1191_v15  ;;  %v1902_v47 = vpop.f32.mrb[17].mxu1 }
 0x36d   :  { %v1194_v24 = vpop.f32.mrb[18].mxu1 }
 0x36e   :  { %1197 = vst [vmem:[#allocation12] sm:$0x3] %v1192_v22  ;;  %v1903_v50 = vpop.f32.mrb[19].mxu1 }
 0x38b   :  { %v1805_v39 = vpop.f32.mrb[20].mxu1 }
 0x38c   :  { %v1806_v43 = vpop.f32.mrb[21].mxu1 }
 0x38d   :  { %v1807_v45 = vadd.f32 %v1806_v43, %v1805_v39  ;;  %v1808_v48 = vpop.f32.mrb[22].mxu1 }
 0x38e   :  { %v1809_v52 = vpop.f32.mrb[23].mxu1 }
 0x38f   :  { %v1327_v40 = vadd.f32 %v1807_v45, %v1287_v38 }
 0x391   :  { %v1367_v44 = vadd.f32 %v1829_v42, %v1327_v40 }
 0x3ab   :  { %v1849_v51 = vpop.f32.mrb[24].mxu1 }
 0x3ac   :  { %v1850_v10 = vpop.f32.mrb[25].mxu1 }
 0x3ad   :  { %v1851_v12 = vadd.f32 %v1850_v10, %v1849_v51  ;;  %v1852_v14 = vpop.f32.mrb[26].mxu1 }
 0x3ae   :  { %v1853_v16 = vpop.f32.mrb[27].mxu1 }
 0x3af   :  { %v1407_v18 = vadd.f32 %v1851_v12, %v1367_v44 }
 0x3b1   :  { %v1412_v20 = vmax.f32 %v1407_v18, 0.0 }
 0x3b3   :  { %v1413_v25 = vpack.c.bf16 %v1412_v20, %v1412_v20 }
 0x3b5   :  { %1921 = vmatmul.mubr.bf16.vlgmr.msra.gmra.mrb[28].mxu0 %v1413_v25 }
 0x3b6   :  { %2143 = shalt.err (!%p2140_p2)
}
 0x3b7   :  { %s2144_s11 = scalar_lea.hbm %s2827_s8, 32 }
 0x3b8   :  { %p2145_p3 = scmp.ne.s32.totalorder %s2827_s8, %s2144_s11  ;;  %p2148_p4 = scmp.lt.u32.totalorder %s2144_s11, %s2827_s8 }
 0x3ba   :  { %p2150_p5 = pnand %p2148_p4, %p2145_p3 }
 0x3bc   :  { %2153 = shalt.err (!%p2150_p5)
}
 0x3bd   :  { %1474 = dma.vmem_to_hbm [thread:$0]  %s1472_s25, 32, %s2827_s8, [#allocation13]  }
 0x3be   :  { %s2154_s19 = scalar_lea.vmem %s1462_s27, 32  ;;  %p2159_p7 = scmp.lt.s32.totalorder %s1462_s27, %s1462_s27 }
 0x3bf   :  { %p2155_p6 = scmp.ne.s32.totalorder %s1462_s27, %s2154_s19  ;;  %p2160_p8 = scmp.lt.s32.totalorder %s2154_s19, %s2154_s19 }
 0x3c1   :  { %p2161_p9 = por %p2160_p8, %p2159_p7 }
 0x3c3   :  { %p2162_p10 = pnand %p2161_p9, %p2155_p6 }
 0x3c5   :  { %2165 = shalt.err (!%p2162_p10)
}
 0x3c6   :  { %s2166_s22 = scalar_lea.hbm %s2826_s7, 32 }
 0x3c7   :  { %p2167_p11 = scmp.ne.s32.totalorder %s2826_s7, %s2166_s22  ;;  %p2170_p12 = scmp.lt.u32.totalorder %s2166_s22, %s2826_s7 }
 0x3c9   :  { %p2172_p13 = pnand %p2170_p12, %p2167_p11 }
 0x3cb   :  { %2175 = shalt.err (!%p2172_p13)
}
 0x3cc   :  { %1464 = dma.vmem_to_hbm [thread:$0]  %s1462_s27, 32, %s2826_s7, [#allocation4]  }
 0x3cd   :  { %s2220_s17 = smov [#allocation14]  }
 0x3ce   :  { %s1481_s5 = sshll.u32 %s2220_s17, 4  ;;  %s1482_s5 = int_to_ptr.vmem [resolvable:$true] %s1481_s5 }
 0x3cf   :  { %s2176_s1 = scalar_lea.vmem %s1482_s5, 32  ;;  %p2181_p1 = scmp.lt.s32.totalorder %s1482_s5, %s1482_s5 }
 0x3d0   :  { %p2177_p0 = scmp.ne.s32.totalorder %s1482_s5, %s2176_s1  ;;  %p2182_p2 = scmp.lt.s32.totalorder %s2176_s1, %s2176_s1 }
 0x3d2   :  { %p2183_p3 = por %p2182_p2, %p2181_p1 }
 0x3d4   :  { %p2184_p4 = pnand %p2183_p3, %p2177_p0 }
 0x488   :  { %v1448_v33 = vpop.f32.mrb[28].mxu0 }
 0x489   :  { %v1449_v27 = vadd.f32 %v2737_v31, %v1448_v33  ;;  %v1922_v55 = vpop.f32.mrb[29].mxu0 }
 0x48a   :  { %v1451_v23 = vpop.f32.mrb[30].mxu0 }
 0x48b   :  { %1454 = vst [vmem:[#allocation14] sm:$0x3] %v1449_v27  ;;  %v1923_v36 = vpop.f32.mrb[31].mxu0 }
 0x48c   :  { %2187 = shalt.err (!%p2184_p4)
}
 0x48d   :  { %s2188_s7 = scalar_lea.hbm %s2828_s9, 32 }
 0x48e   :  { %p2189_p5 = scmp.ne.s32.totalorder %s2828_s9, %s2188_s7  ;;  %p2192_p6 = scmp.lt.u32.totalorder %s2188_s7, %s2828_s9 }
 0x490   :  { %p2194_p7 = pnand %p2192_p6, %p2189_p5 }
 0x492   :  { %2197 = shalt.err (!%p2194_p7)
}
 0x493   :  { %1484 = dma.vmem_to_hbm [thread:$0]  %s1482_s5, 32, %s2828_s9, [#allocation13]  }
 0x494   :  { %2204 = dma.done.wait [#allocation4], 32  }
 0x495   :  { %2205 = vsyncadd [#allocation4], 4294967264 }
 0x496   :  { %2206 = dma.done.wait [#allocation13], 64  }
 0x497   :  { %2207 = vsyncadd [#allocation13], 4294967232 }
 0x498   :  { %1494 = vsyncpa [#allocation3], 1 }
 0x499   :  { %1495 = vsyncpa [#allocation6], 1 }
 0x49a   :  { %1496 = vsyncpa [#allocation9], 1 }
 0x49b   :  { %1497 = vsyncpa [#allocation4], 1 }
 0x49c   :  { %1498 = vsyncpa [#allocation13], 1 }

</bundles_post_ra>
